<compile_context>
chip_gen: v7x
topology: tpu7x:2x2x1
jax: 0.10.0
libtpu: 0.0.40
codegen_flags: <defaults>
</compile_context>

<pallas_src>
import functools

import jax
import jax.numpy as jnp
from jax import lax
from jax.experimental import pallas as pl
from jax.experimental.pallas import tpu as pltpu

LANE = 128
SUB = 8


def _rup(v, m):
    return -(-v // m) * m


def _device_defaults():
    """Return (is_v5e, vmem_capacity_bytes) with conservative fallbacks."""
    is_v5e = False
    try:
        kind = jax.devices()[0].device_kind.lower()
        is_v5e = ("v5 lite" in kind) or ("v5e" in kind) or ("v5litepod" in kind)
    except Exception:
        pass
    try:
        vmem_cap = int(pltpu.get_tpu_info().vmem_capacity_bytes)
    except Exception:
        vmem_cap = 64 * 1024 * 1024   # conservative: v7x per-TC VMEM
    return is_v5e, vmem_cap


def _sublayer_ffn_kernel(x_ref, g_ref, bt_ref, w1_ref, b1_ref, w2_ref, b2_ref,
                         o_ref, normed_ref, acc_ref, *, d_model, eps,
                         lane_padded):
    # Shapes (padded / lane-dense):
    #   x_ref (tm, Dp)   g_ref/bt_ref/b2_ref (1, Dp)
    #   w1_ref (Dp, tf)  b1_ref (1, tf)  w2_ref (tf, Dp)
    #   o_ref (tm, Dp)   normed_ref (tm, Dp)  acc_ref (tm, Dp) f32
    j = pl.program_id(1)

    @pl.when(j == 0)
    def _():
        # LayerNorm once per row tile (f32 stats), torch-module semantics:
        # unbiased std, eps added to the std.
        x = x_ref[...].astype(jnp.float32)
        if lane_padded:
            lane = lax.broadcasted_iota(jnp.int32, x.shape, 1)
            mask = (lane < d_model).astype(jnp.float32)
            xm = x * mask
        else:
            xm = x
        mean = jnp.sum(xm, axis=-1, keepdims=True) * (1.0 / d_model)
        diff = x - mean
        if lane_padded:
            diff = diff * mask
        var = jnp.sum(diff * diff, axis=-1, keepdims=True) * (1.0 / (d_model - 1))
        inv = 1.0 / (jnp.sqrt(var) + eps)
        normed = (g_ref[...].astype(jnp.float32) * diff * inv
                  + bt_ref[...].astype(jnp.float32))
        normed_ref[...] = normed.astype(normed_ref.dtype)   # MXU operand dtype
        acc_ref[...] = jnp.zeros_like(acc_ref)

    # FFN over this d_ff chunk, f32 accumulation on the MXU.
    h = jnp.dot(normed_ref[...], w1_ref[...],
                preferred_element_type=jnp.float32)
    h = jnp.maximum(h + b1_ref[...].astype(jnp.float32), 0.0)       # ReLU
    acc_ref[...] += jnp.dot(h.astype(w2_ref.dtype), w2_ref[...],
                            preferred_element_type=jnp.float32)

    @pl.when(j == pl.num_programs(1) - 1)
    def _():
        # dropout: identity in eval mode.  Residual re-reads the (resident)
        # x tile instead of keeping an f32 copy live across the matmuls.
        out = (x_ref[...].astype(jnp.float32) + acc_ref[...]
               + b2_ref[...].astype(jnp.float32))
        o_ref[...] = out.astype(o_ref.dtype)


def sublayer_connection_ffn(x, gamma, beta, w1_t, b1, w2_t, b2, *,
                            eps=1e-6, tm=None, tf=None):
    """y = x + relu(LayerNorm(x) @ W1^T + b1) @ W2^T + b2  (eval-mode dropout).

    x: (batch, seq, d_model).  w1_t: (d_model, d_ff), w2_t: (d_ff, d_model)
    (nn.Linear weights pre-transposed).  Pass bf16 x / weights for full MXU
    rate and half the activation HBM traffic; LayerNorm statistics and matmul
    accumulation are always f32.
    """
    batch, seq, d_model = x.shape
    d_ff = w1_t.shape[1]
    M = batch * seq

    is_v5e, vmem_cap = _device_defaults()
    feat_align = LANE if is_v5e else 256       # full-width 256 MXU tiles on v6e/v7x
    if tm is None:
        tm = 128 if is_v5e else 256            # 128 rows already saturate v5e MXU

    # Lane-dense feature dims; only pad when genuinely unaligned.
    lane_padded = (d_model % LANE != 0)
    dmp = d_model if not lane_padded else _rup(d_model, feat_align)
    dfp = d_ff if d_ff % LANE == 0 else _rup(d_ff, feat_align)

    # d_ff chunk size (inner reduction grid axis).
    if tf is None:
        if dfp <= 512:
            tf = dfp
        else:
            tf = max(c for c in (512, 256, 128) if dfp % c == 0)

    # Row tile.
    tm_eff = min(tm, _rup(M, SUB))
    # v7x has 2 TensorCores: give the "parallel" row axis >= 2 tiles if we can.
    if (not is_v5e) and (_rup(M, tm_eff) // tm_eff < 2) and M > SUB:
        tm_eff = _rup(-(-M // 2), SUB)

    x_bytes = jnp.dtype(x.dtype).itemsize
    w_bytes = jnp.dtype(w1_t.dtype).itemsize

    def est_vmem(tm_, tf_):
        return (2 * tm_ * dmp * x_bytes                      # x tiles (2-buf)
                + 2 * tm_ * dmp * x_bytes                    # out tiles (2-buf)
                + 3 * dmp * w_bytes                          # resident g/b/b2
                + 2 * (dmp * tf_ + tf_ + tf_ * dmp) * w_bytes  # streamed W1/b1/W2
                + tm_ * dmp * w_bytes                        # normed scratch
                + tm_ * dmp * 4                              # f32 accumulator
                + tm_ * tf_ * 4)                             # f32 h intermediate

    # Device-derived VMEM budget with headroom; shrink tiles instead of
    # requesting more VMEM than the chip has.
    budget = max(vmem_cap - 8 * 1024 * 1024, 16 * 1024 * 1024)
    while est_vmem(tm_eff, tf) > budget and (tm_eff > SUB or tf > LANE):
        if tm_eff > SUB:
            tm_eff = max(SUB, _rup(tm_eff // 2, SUB))
        elif tf > 256 and dfp % 256 == 0:
            tf = 256
        else:
            tf = LANE

    mp = _rup(M, tm_eff)
    rows_padded = (mp != M)
    n_ff = dfp // tf

    # Pad only when needed (aligned production case: zero extra HBM passes).
    needs_pad_x = lane_padded or rows_padded
    if needs_pad_x:
        x2d = jnp.zeros((mp, dmp), x.dtype).at[:M, :d_model].set(
            x.reshape(M, d_model))
    else:
        x2d = x.reshape(M, d_model)

    if lane_padded:
        g2d = jnp.zeros((1, dmp), gamma.dtype).at[0, :d_model].set(gamma)
        bt2d = jnp.zeros((1, dmp), beta.dtype).at[0, :d_model].set(beta)
        b2p = jnp.zeros((1, dmp), b2.dtype).at[0, :d_model].set(b2)
    else:
        g2d = gamma.reshape(1, d_model)
        bt2d = beta.reshape(1, d_model)
        b2p = b2.reshape(1, d_model)

    if lane_padded or dfp != d_ff:
        w1p = jnp.zeros((dmp, dfp), w1_t.dtype).at[:d_model, :d_ff].set(w1_t)
        w2p = jnp.zeros((dfp, dmp), w2_t.dtype).at[:d_ff, :d_model].set(w2_t)
    else:
        w1p, w2p = w1_t, w2_t
    if dfp != d_ff:
        b1p = jnp.zeros((1, dfp), b1.dtype).at[0, :d_ff].set(b1)
    else:
        b1p = b1.reshape(1, d_ff)

    est = est_vmem(tm_eff, tf)
    vmem_limit = int(min(budget, max(int(1.5 * est), 32 * 1024 * 1024)))

    # Grid-invariant params: single-buffered, DMA'd once, stay resident.
    def resident(shape):
        return pl.BlockSpec(shape, lambda i, j: (0, 0),
                            pipeline_mode=pl.Buffered(1))

    kernel = functools.partial(_sublayer_ffn_kernel, d_model=d_model, eps=eps,
                               lane_padded=lane_padded)

    out = pl.pallas_call(
        kernel,
        out_shape=jax.ShapeDtypeStruct((mp, dmp), x.dtype),
        grid_spec=pltpu.PrefetchScalarGridSpec(
            num_scalar_prefetch=0,
            grid=(mp // tm_eff, n_ff),
            in_specs=[
                pl.BlockSpec((tm_eff, dmp), lambda i, j: (i, 0)),   # x rows
                resident((1, dmp)),                                  # LN gamma
                resident((1, dmp)),                                  # LN beta
                pl.BlockSpec((dmp, tf), lambda i, j: (0, j)),        # W1^T chunk
                pl.BlockSpec((1, tf), lambda i, j: (0, j)),          # b1 chunk
                pl.BlockSpec((tf, dmp), lambda i, j: (j, 0)),        # W2^T chunk
                resident((1, dmp)),                                  # b2
            ],
            out_specs=pl.BlockSpec((tm_eff, dmp), lambda i, j: (i, 0)),
            scratch_shapes=[
                pltpu.VMEM((tm_eff, dmp), w1p.dtype),    # LayerNorm(x)
                pltpu.VMEM((tm_eff, dmp), jnp.float32),  # FFN accumulator
            ]),
        compiler_params=pltpu.CompilerParams(
            dimension_semantics=("parallel", "arbitrary"),
            vmem_limit_bytes=vmem_limit),
    )(x2d, g2d, bt2d, w1p, b1p, w2p, b2p)

    if needs_pad_x:
        out = out[:M, :d_model]
    return out.reshape(batch, seq, d_model)


if __name__ == "__main__":
    # Small shapes consistent with the module: size (d_model)=32, FFN hidden
    # d_ff=64, batch=2, seq=8.  Dropout in eval mode.
    batch, seq, d_model, d_ff = 2, 8, 32, 64
    eps = 1e-6

    key = jax.random.PRNGKey(0)
    kx, kg, kb, kw1, kb1, kw2, kb2 = jax.random.split(key, 7)

    x = jax.random.normal(kx, (batch, seq, d_model), dtype=jnp.float32)

    # LayerNorm params (module init is ones/zeros; perturb to exercise them).
    gamma = 1.0 + 0.1 * jax.random.normal(kg, (d_model,), dtype=jnp.float32)
    beta = 0.1 * jax.random.normal(kb, (d_model,), dtype=jnp.float32)

    # FFN sublayer params (nn.Linear layout: weight (out, in)).
    bound1 = 1.0 / (d_model ** 0.5)
    w1 = jax.random.uniform(kw1, (d_ff, d_model), minval=-bound1, maxval=bound1)
    b1 = jax.random.uniform(kb1, (d_ff,), minval=-bound1, maxval=bound1)
    bound2 = 1.0 / (d_ff ** 0.5)
    w2 = jax.random.uniform(kw2, (d_model, d_ff), minval=-bound2, maxval=bound2)
    b2 = jax.random.uniform(kb2, (d_model,), minval=-bound2, maxval=bound2)

    # Pure-JAX reference matching the PyTorch module (eval-mode dropout).
    mean = x.mean(-1, keepdims=True)
    std = jnp.std(x, axis=-1, keepdims=True, ddof=1)     # torch std: unbiased
    normed = gamma * (x - mean) / (std + eps) + beta
    ref = x + (jnp.maximum(normed @ w1.T + b1, 0.0) @ w2.T + b2)

    # f32 run: exact numerics check.
    out = sublayer_connection_ffn(x, gamma, beta, w1.T, b1, w2.T, b2, eps=eps)
    out = jax.block_until_ready(out)
    assert out.shape == (batch, seq, d_model)
    err = float(jnp.max(jnp.abs(out - ref)))
    assert jnp.allclose(out, ref, atol=1e-4, rtol=1e-4), err

    # bf16 run (production path: bf16 operands, f32 accumulation): loose check.
    out_bf16 = sublayer_connection_ffn(
        x.astype(jnp.bfloat16), gamma.astype(jnp.bfloat16),
        beta.astype(jnp.bfloat16), w1.T.astype(jnp.bfloat16),
        b1.astype(jnp.bfloat16), w2.T.astype(jnp.bfloat16),
        b2.astype(jnp.bfloat16), eps=eps)
    out_bf16 = jax.block_until_ready(out_bf16)
    err_bf16 = float(jnp.max(jnp.abs(out_bf16.astype(jnp.float32) - ref)))
    assert err_bf16 < 0.2, err_bf16

    print("KERNEL_OK")
</pallas_src>

<mosaic_0001>
module attributes {stable_mosaic.version = 11 : i64} {
  func.func @_sublayer_ffn_kernel(%arg0: i32, %arg1: i32, %arg2: memref<8x256xf32, #tpu.memory_space<vmem>>, %arg3: memref<1x256xf32, #tpu.memory_space<vmem>>, %arg4: memref<1x256xf32, #tpu.memory_space<vmem>>, %arg5: memref<256x256xf32, #tpu.memory_space<vmem>>, %arg6: memref<1x256xf32, #tpu.memory_space<vmem>>, %arg7: memref<256x256xf32, #tpu.memory_space<vmem>>, %arg8: memref<1x256xf32, #tpu.memory_space<vmem>>, %arg9: memref<8x256xf32, #tpu.memory_space<vmem>>, %arg10: memref<8x256xf32, #tpu.memory_space<vmem>>, %arg11: memref<8x256xf32, #tpu.memory_space<vmem>>) attributes {dimension_semantics = [#tpu.dimension_semantics<parallel>, #tpu.dimension_semantics<arbitrary>], iteration_bounds = array<i64: 2, 1>, scalar_prefetch = 0 : i64, scratch_operands = 2 : i64, tpu.core_type = #tpu.core_type<tc>, window_params = [{transform_indices = @transform_0, window_bounds = array<i64: 8, 256>}, {pipeline_mode = #tpu.pipeline_mode<synchronous>, transform_indices = @transform_1, window_bounds = array<i64: 1, 256>}, {pipeline_mode = #tpu.pipeline_mode<synchronous>, transform_indices = @transform_2, window_bounds = array<i64: 1, 256>}, {transform_indices = @transform_3, window_bounds = array<i64: 256, 256>}, {transform_indices = @transform_4, window_bounds = array<i64: 1, 256>}, {transform_indices = @transform_5, window_bounds = array<i64: 256, 256>}, {pipeline_mode = #tpu.pipeline_mode<synchronous>, transform_indices = @transform_6, window_bounds = array<i64: 1, 256>}, {transform_indices = @transform_7, window_bounds = array<i64: 8, 256>}]} {
    %c0_i32 = arith.constant 0 : i32
    %0 = arith.cmpi eq, %arg1, %c0_i32 : i32
    %1 = arith.extui %0 : i1 to i32
    %c0_i32_0 = arith.constant 0 : i32
    %2 = arith.cmpi ne, %1, %c0_i32_0 : i32
    scf.if %2 {
      %c0_16 = arith.constant 0 : index
      %c0_17 = arith.constant 0 : index
      %19 = vector.load %arg2[%c0_16, %c0_17] : memref<8x256xf32, #tpu.memory_space<vmem>>, vector<8x256xf32>
      %20 = tpu.iota {dimensions = array<i32: 1>} : vector<8x256xi32>
      %c32_i32 = arith.constant 32 : i32
      %21 = vector.broadcast %c32_i32 : i32 to vector<8x256xi32>
      %22 = arith.cmpi slt, %20, %21 : vector<8x256xi32>
      %23 = arith.extui %22 : vector<8x256xi1> to vector<8x256xi32>
      %24 = arith.sitofp %23 : vector<8x256xi32> to vector<8x256xf32>
      %25 = arith.mulf %19, %24 : vector<8x256xf32>
      %cst_18 = arith.constant dense<0.000000e+00> : vector<8xf32>
      %26 = vector.multi_reduction <add>, %25, %cst_18 [1] : vector<8x256xf32> to vector<8xf32>
      %27 = vector.shape_cast %26 : vector<8xf32> to vector<8x1xf32>
      %cst_19 = arith.constant 3.125000e-02 : f32
      %28 = vector.broadcast %cst_19 : f32 to vector<8x1xf32>
      %29 = arith.mulf %27, %28 : vector<8x1xf32>
      %30 = vector.broadcast %29 : vector<8x1xf32> to vector<8x256xf32>
      %31 = arith.subf %19, %30 : vector<8x256xf32>
      %32 = arith.mulf %31, %24 : vector<8x256xf32>
      %33 = arith.mulf %32, %32 : vector<8x256xf32>
      %cst_20 = arith.constant dense<0.000000e+00> : vector<8xf32>
      %34 = vector.multi_reduction <add>, %33, %cst_20 [1] : vector<8x256xf32> to vector<8xf32>
      %35 = vector.shape_cast %34 : vector<8xf32> to vector<8x1xf32>
      %cst_21 = arith.constant 0.0322580636 : f32
      %36 = vector.broadcast %cst_21 : f32 to vector<8x1xf32>
      %37 = arith.mulf %35, %36 : vector<8x1xf32>
      %38 = math.sqrt %37 : vector<8x1xf32>
      %cst_22 = arith.constant 9.99999997E-7 : f32
      %39 = vector.broadcast %cst_22 : f32 to vector<8x1xf32>
      %40 = arith.addf %38, %39 : vector<8x1xf32>
      %cst_23 = arith.constant 1.000000e+00 : f32
      %41 = vector.broadcast %cst_23 : f32 to vector<8x1xf32>
      %42 = arith.divf %41, %40 : vector<8x1xf32>
      %c0_24 = arith.constant 0 : index
      %c0_25 = arith.constant 0 : index
      %43 = vector.load %arg3[%c0_24, %c0_25] : memref<1x256xf32, #tpu.memory_space<vmem>>, vector<1x256xf32>
      %44 = vector.broadcast %43 : vector<1x256xf32> to vector<8x256xf32>
      %45 = arith.mulf %44, %32 : vector<8x256xf32>
      %46 = vector.broadcast %42 : vector<8x1xf32> to vector<8x256xf32>
      %47 = arith.mulf %45, %46 : vector<8x256xf32>
      %c0_26 = arith.constant 0 : index
      %c0_27 = arith.constant 0 : index
      %48 = vector.load %arg4[%c0_26, %c0_27] : memref<1x256xf32, #tpu.memory_space<vmem>>, vector<1x256xf32>
      %49 = vector.broadcast %48 : vector<1x256xf32> to vector<8x256xf32>
      %50 = arith.addf %47, %49 : vector<8x256xf32>
      %c0_28 = arith.constant 0 : index
      %c0_29 = arith.constant 0 : index
      %51 = vector.load %arg10[%c0_28, %c0_29] : memref<8x256xf32, #tpu.memory_space<vmem>>, vector<8x256xf32>
      tpu.vector_store %arg10[%c0_28, %c0_29], %50 {strides = array<i32>} : memref<8x256xf32, #tpu.memory_space<vmem>>, vector<8x256xf32>,
      %cst_30 = arith.constant 0.000000e+00 : f32
      %52 = vector.broadcast %cst_30 : f32 to vector<8x256xf32>
      %c0_31 = arith.constant 0 : index
      %c0_32 = arith.constant 0 : index
      %53 = vector.load %arg11[%c0_31, %c0_32] : memref<8x256xf32, #tpu.memory_space<vmem>>, vector<8x256xf32>
      tpu.vector_store %arg11[%c0_31, %c0_32], %52 {strides = array<i32>} : memref<8x256xf32, #tpu.memory_space<vmem>>, vector<8x256xf32>,
    } else {
    }
    %c0 = arith.constant 0 : index
    %c0_1 = arith.constant 0 : index
    %3 = vector.load %arg10[%c0, %c0_1] : memref<8x256xf32, #tpu.memory_space<vmem>>, vector<8x256xf32>
    %c0_2 = arith.constant 0 : index
    %c0_3 = arith.constant 0 : index
    %4 = vector.load %arg5[%c0_2, %c0_3] : memref<256x256xf32, #tpu.memory_space<vmem>>, vector<256x256xf32>
    %cst = arith.constant dense<0.000000e+00> : vector<8x256xf32>
    %5 = tpu.matmul %3, %4, %cst {dimension_numbers = #tpu.dot_dimension_numbers<[1], [0], [0], [1], [0, 0, 1, 1], [], []>} : vector<8x256xf32>, vector<256x256xf32>, vector<8x256xf32> -> vector<8x256xf32>
    %c0_4 = arith.constant 0 : index
    %c0_5 = arith.constant 0 : index
    %6 = vector.load %arg6[%c0_4, %c0_5] : memref<1x256xf32, #tpu.memory_space<vmem>>, vector<1x256xf32>
    %7 = vector.broadcast %6 : vector<1x256xf32> to vector<8x256xf32>
    %8 = arith.addf %5, %7 : vector<8x256xf32>
    %cst_6 = arith.constant 0.000000e+00 : f32
    %9 = vector.broadcast %cst_6 : f32 to vector<8x256xf32>
    %10 = arith.maximumf %8, %9 : vector<8x256xf32>
    %c0_7 = arith.constant 0 : index
    %c0_8 = arith.constant 0 : index
    %11 = vector.load %arg11[%c0_7, %c0_8] : memref<8x256xf32, #tpu.memory_space<vmem>>, vector<8x256xf32>
    %c0_9 = arith.constant 0 : index
    %c0_10 = arith.constant 0 : index
    %12 = vector.load %arg7[%c0_9, %c0_10] : memref<256x256xf32, #tpu.memory_space<vmem>>, vector<256x256xf32>
    %cst_11 = arith.constant dense<0.000000e+00> : vector<8x256xf32>
    %13 = tpu.matmul %10, %12, %cst_11 {dimension_numbers = #tpu.dot_dimension_numbers<[1], [0], [0], [1], [0, 0, 1, 1], [], []>} : vector<8x256xf32>, vector<256x256xf32>, vector<8x256xf32> -> vector<8x256xf32>
    %14 = arith.addf %11, %13 : vector<8x256xf32>
    %c0_12 = arith.constant 0 : index
    %c0_13 = arith.constant 0 : index
    %15 = vector.load %arg11[%c0_12, %c0_13] : memref<8x256xf32, #tpu.memory_space<vmem>>, vector<8x256xf32>
    tpu.vector_store %arg11[%c0_12, %c0_13], %14 {strides = array<i32>} : memref<8x256xf32, #tpu.memory_space<vmem>>, vector<8x256xf32>,
    %c0_i32_14 = arith.constant 0 : i32
    %16 = arith.cmpi eq, %arg1, %c0_i32_14 : i32
    %17 = arith.extui %16 : i1 to i32
    %c0_i32_15 = arith.constant 0 : i32
    %18 = arith.cmpi ne, %17, %c0_i32_15 : i32
    scf.if %18 {
      %c0_16 = arith.constant 0 : index
      %c0_17 = arith.constant 0 : index
      %19 = vector.load %arg2[%c0_16, %c0_17] : memref<8x256xf32, #tpu.memory_space<vmem>>, vector<8x256xf32>
      %c0_18 = arith.constant 0 : index
      %c0_19 = arith.constant 0 : index
      %20 = vector.load %arg11[%c0_18, %c0_19] : memref<8x256xf32, #tpu.memory_space<vmem>>, vector<8x256xf32>
      %21 = arith.addf %19, %20 : vector<8x256xf32>
      %c0_20 = arith.constant 0 : index
      %c0_21 = arith.constant 0 : index
      %22 = vector.load %arg8[%c0_20, %c0_21] : memref<1x256xf32, #tpu.memory_space<vmem>>, vector<1x256xf32>
      %23 = vector.broadcast %22 : vector<1x256xf32> to vector<8x256xf32>
      %24 = arith.addf %21, %23 : vector<8x256xf32>
      %c0_22 = arith.constant 0 : index
      %c0_23 = arith.constant 0 : index
      %25 = vector.load %arg9[%c0_22, %c0_23] : memref<8x256xf32, #tpu.memory_space<vmem>>, vector<8x256xf32>
      tpu.vector_store %arg9[%c0_22, %c0_23], %24 {strides = array<i32>} : memref<8x256xf32, #tpu.memory_space<vmem>>, vector<8x256xf32>,
    } else {
    }
    return
  }
  func.func @transform_0(%arg0: i32, %arg1: i32) -> (i32, i32) {
    %c0_i32 = arith.constant 0 : i32
    %c0_i32_0 = arith.constant 0 : i32
    return %arg0, %c0_i32 : i32, i32
  }
  func.func @transform_1(%arg0: i32, %arg1: i32) -> (i32, i32) {
    %c0_i32 = arith.constant 0 : i32
    %c0_i32_0 = arith.constant 0 : i32
    %c0_i32_1 = arith.constant 0 : i32
    return %c0_i32, %c0_i32_0 : i32, i32
  }
  func.func @transform_2(%arg0: i32, %arg1: i32) -> (i32, i32) {
    %c0_i32 = arith.constant 0 : i32
    %c0_i32_0 = arith.constant 0 : i32
    %c0_i32_1 = arith.constant 0 : i32
    return %c0_i32, %c0_i32_0 : i32, i32
  }
  func.func @transform_3(%arg0: i32, %arg1: i32) -> (i32, i32) {
    %c0_i32 = arith.constant 0 : i32
    %c0_i32_0 = arith.constant 0 : i32
    return %c0_i32, %arg1 : i32, i32
  }
  func.func @transform_4(%arg0: i32, %arg1: i32) -> (i32, i32) {
    %c0_i32 = arith.constant 0 : i32
    %c0_i32_0 = arith.constant 0 : i32
    return %c0_i32, %arg1 : i32, i32
  }
  func.func @transform_5(%arg0: i32, %arg1: i32) -> (i32, i32) {
    %c0_i32 = arith.constant 0 : i32
    %c0_i32_0 = arith.constant 0 : i32
    return %arg1, %c0_i32 : i32, i32
  }
  func.func @transform_6(%arg0: i32, %arg1: i32) -> (i32, i32) {
    %c0_i32 = arith.constant 0 : i32
    %c0_i32_0 = arith.constant 0 : i32
    %c0_i32_1 = arith.constant 0 : i32
    return %c0_i32, %c0_i32_0 : i32, i32
  }
  func.func @transform_7(%arg0: i32, %arg1: i32) -> (i32, i32) {
    %c0_i32 = arith.constant 0 : i32
    %c0_i32_0 = arith.constant 0 : i32
    return %arg0, %c0_i32 : i32, i32
  }
}

</mosaic_0001>

<bundles_post_ra>
// kernel: tpu_custom_call.1
= control target key start
LH: loop header
LB: loop body
LE: loop exit
PB: predicated region body
PF: predicated region fallthrough
CT: control target
= control target key end

     0   :  { %12 = vsyncpa [#allocation5], 0  ;;  %s1648_s0 = inlined_call_operand.hbm [shape: f32[16,256], index: 0, kind: input, shape index: {}]   ;;  %s1649_s1 = inlined_call_operand.vmem [shape: f32[1,256], index: 1, kind: input, shape index: {}]   ;;  %s1650_s2 = inlined_call_operand.vmem [shape: f32[1,256], index: 2, kind: input, shape index: {}]   ;;  %s1651_s3 = inlined_call_operand.hbm [shape: f32[256,256], index: 3, kind: input, shape index: {}]   ;;  %s1652_s4 = inlined_call_operand.vmem [shape: f32[1,256], index: 4, kind: input, shape index: {}]   ;;  %s1653_s5 = inlined_call_operand.hbm [shape: f32[256,256], index: 5, kind: input, shape index: {}]   ;;  %s1654_s6 = inlined_call_operand.vmem [shape: f32[1,256], index: 6, kind: input, shape index: {}]   ;;  %s1655_s7 = inlined_call_operand.hbm [shape: f32[16,256], index: 7, kind: output, shape index: {}]  }
   0x1   :  { %14 = vsyncpa [#allocation5 + $0x1], 0 }
   0x2   :  { %15 = vsyncpa [#allocation8], 0 }
   0x3   :  { %16 = vsyncpa [#allocation6], 0 }
   0x4   :  { %18 = vsyncpa [#allocation6 + $0x1], 0  ;;  %s1356_s24 = smov 0   ;;  %s1358_s25 = smov 0  }
   0x5   :  { %s1360_s26 = smov 0   ;;  %s1362_s27 = smov 0  }
   0x6   :  { %s1364_s28 = smov 0   ;;  %s1366_s29 = smov 0  }
   0x7 LB: > { %1662 = sst [smem:[#allocation14_spill]] %s1287_s24  ;;  %s894_s30 = sadd.s32 4294967295, %s1307_s29   ;;  %s1307_s29 = sphi %s1366_s29, %s24_s29   ;;  %s1303_s28 = sphi %s1364_s28, %s1683_s28   ;;  %s1299_s27 = sphi %s1362_s27, %s1682_s27   ;;  %s1295_s26 = sphi %s1360_s26, %s1681_s26   ;;  %s1291_s25 = sphi %s1358_s25, %s1680_s25   ;;  %s1287_s24 = sphi %s1356_s24, %s1679_s24  }
   0x8   : > { %s895_s8 = sadd.s32 4294967294, %s1307_s29   ;;  %p56_p0 = scmp.ne.s32.totalorder %s1291_s25, %s1287_s24 }
   0x9   : > { %p1390_p1 = scmp.eq.s32.totalorder %s894_s30, 0  ;;  %p1394_p2 = scmp.eq.s32.totalorder %s894_s30, 1 }
   0xa   : > { %p227_p3 = scmp.eq.s32.totalorder %s895_s8, 1  ;;  %p896_p5 = scmp.ge.s32.totalorder %s1307_s29, 1 }
   0xb   : > { %s1663_s9 = scalar_select %p1390_p1, 1, 0 }
   0xc   : > { %p1400_p4 = por %p1390_p1, %p56_p0  ;;  %p1405_p6 = por %p227_p3, %p56_p0 }
   0xd   : > { %p234_p7 = scmp.lt.s32.totalorder %s1307_s29, 3  ;;  %s1309_s14 = smov [#allocation7]  }
   0xe   : > { %s1665_s11 = scalar_select %p1400_p4, 1, 0 }
   0xf   : > { %s1666_s12 = scalar_select %p1405_p6, 1, 0 }
  0x10   : > { %p1410_p8 = pnand %p896_p5, %p234_p7  ;;  %s255_s15 = sshll.u32 %s1309_s14, 4  ;;  %s1414_s15 = int_to_ptr.vmem [resolvable:$true] %s255_s15 }
  0x11   : > { %1667 = sst [smem:[#allocation15_spill]] %s1666_s12  ;;  %s1310_s17 = smov [#allocation9]  }
  0x12   : > { %p1057_p9 = pneg %p1410_p8  ;;  %s280_s18 = sshll.u32 %s1310_s17, 4  ;;  %s1425_s18 = int_to_ptr.vmem [resolvable:$true] %s280_s18 }
  0x13   : > { %s1135_s21 = scalar_lea.hbm %s1651_s3, 8192 }
  0x14   : > { %p1421_p11 = pnand %p1057_p9, %p1390_p1  ;;  %p1136_p12 = scmp.ne.s32.totalorder %s1651_s3, %s1135_s21 }
  0x15   : > { %p1142_p5 = scmp.lt.u32.totalorder %s1135_s21, %s1651_s3 }
  0x16   : > { %p1137_p13 = pneg %p1421_p11 }
  0x18   : > { %p1138_p0 = pnand %p1137_p13, %p1136_p12 }
  0x1a   : > { %p1139_p3 = pneg %p1138_p0 }
  0x1c   : > { %p1144_p7 = pnand %p1142_p5, %p1139_p3 }
  0x1e   : > { %1147 = shalt.err (!%p1144_p7)
}
  0x1f   : > { %s1148_s14 = scalar_lea.vmem %s1414_s15, 8192  ;;  %p1156_p1 = scmp.lt.s32.totalorder %s1414_s15, %s1414_s15 }
  0x20   : > { %p1149_p9 = scmp.ne.s32.totalorder %s1414_s15, %s1148_s14  ;;  %p1157_p12 = scmp.lt.s32.totalorder %s1148_s14, %s1148_s14 }
  0x22   : > { %p1151_p10 = pnand %p1149_p9, %p1137_p13  ;;  %p1158_p0 = por %p1157_p12, %p1156_p1 }
  0x24   : > { %p1152_p6 = pneg %p1151_p10 }
  0x26   : > { %p1159_p4 = pnand %p1158_p0, %p1152_p6 }
  0x28   : > { %1162 = shalt.err (!%p1159_p4)
}
  0x29   : > { %s1311_s17 = smov 256   ;;  %s1312_s19 = smov 16  }
  0x2a   : > { %1060 = dma.hbm_to_vmem [thread:$0]  (!%p1421_p11), %s1651_s3, 8192, %s1414_s15, [#allocation8], %s1311_s17, %s1311_s17, %s1312_s19  }
  0x2b   : > { %s1163_s30 = scalar_lea.hbm %s1653_s5, 8192 }
  0x2c   : > { %p1164_p1 = scmp.ne.s32.totalorder %s1653_s5, %s1163_s30  ;;  %p1170_p10 = scmp.lt.u32.totalorder %s1163_s30, %s1653_s5 }
  0x2e   : > { %p1166_p4 = pnand %p1164_p1, %p1137_p13 }
  0x30   : > { %p1167_p6 = pneg %p1166_p4 }
  0x32   : > { %p1172_p3 = pnand %p1170_p10, %p1167_p6 }
  0x34   : > { %1175 = shalt.err (!%p1172_p3)
}
  0x35   : > { %s1176_s15 = scalar_lea.vmem %s1425_s18, 8192  ;;  %p1184_p12 = scmp.lt.s32.totalorder %s1425_s18, %s1425_s18 }
  0x36   : > { %p1177_p5 = scmp.ne.s32.totalorder %s1425_s18, %s1176_s15  ;;  %p1185_p0 = scmp.lt.s32.totalorder %s1176_s15, %s1176_s15 }
  0x38   : > { %p1179_p7 = pnand %p1177_p5, %p1137_p13  ;;  %p1186_p1 = por %p1185_p0, %p1184_p12 }
  0x3a   : > { %p1180_p9 = pneg %p1179_p7 }
  0x3c   : > { %p1187_p4 = pnand %p1186_p1, %p1180_p9 }
  0x3e   : > { %1190 = shalt.err (!%p1187_p4)
}
  0x3f   : > { %1063 = dma.hbm_to_vmem [thread:$0]  (!%p1421_p11), %s1653_s5, 8192, %s1425_s18, [#allocation8], %s1311_s17, %s1311_s17, %s1312_s19  }
  0x40   : > { %s36_s20 = sadd.s32 1, %s1303_s28  ;;  %s43_s21 = sadd.s32 1, %s1295_s26 }
  0x41   : > { %p38_p13 = scmp.ge.s32.totalorder %s36_s20, 2  ;;  %p50_p6 = scmp.ne.s32.totalorder %s1295_s26, %s1291_s25 }
  0x42   : > { %p51_p10 = scmp.eq.s32.totalorder %s1307_s29, 0  ;;  %p1074_p3 = scmp.lt.s32.totalorder %s1307_s29, 2 }
  0x43   : > { %s1685_s20 = smov (%p38_p13, %s36_s20), 0  ;;  %p1489_p7 = por %p1394_p2, %p50_p6 }
  0x44   : > { %p52_p5 = por %p51_p10, %p50_p6  ;;  %s40_s22 = ssub.s32 %s1303_s28, %s1685_s20 }
  0x45   : > { %s1670_s16 = scalar_select %p1489_p7, 1, 0 }
  0x46   : > { %s297_s23 = sand.u32 1, %s1295_s26   ;;  %p41_p9 = scmp.eq.s32.totalorder %s40_s22, 0 }
  0x47   : > { %s901_s18 = sshll.u32 %s297_s23, 4  ;;  %s915_s17 = sshll.u32 %s1303_s28, 8 }
  0x48   : > { %s1498_s19 = scalar_select %p41_p9, %s1295_s26, %s43_s21  }
  0x49   : > { %s1503_s14 = scalar_lea.hbm %s1648_s0, %s915_s17  ;;  %s301_s10 = scalar_lea.vmem [#allocation4], %s901_s18 }
  0x4a   : > { %s309_s15 = sshll.u32 %s301_s10, 4  ;;  %p1507_p2 = pnand %p1074_p3, %p52_p5  ;;  %s1511_s15 = int_to_ptr.vmem [resolvable:$true] %s309_s15 }
  0x4b   : > { %s298_s12 = scalar_lea.sflag [#allocation5], %s297_s23  ;;  %s1191_s21 = scalar_lea.hbm %s1503_s14, 256 }
  0x4c   : > { %p1192_p11 = scmp.ne.s32.totalorder %s1503_s14, %s1191_s21  ;;  %p1193_p12 = pneg %p1507_p2 }
  0x4d   : > { %s1196_s17 = scalar_lea.hbm %s1648_s0, 512  ;;  %p1197_p4 = scmp.lt.u32.totalorder %s1503_s14, %s1648_s0 }
  0x4e   : > { %p1194_p0 = pnand %p1193_p12, %p1192_p11  ;;  %p1198_p13 = scmp.lt.u32.totalorder %s1196_s17, %s1191_s21 }
  0x4f   : > { %p1200_p10 = scmp.lt.u32.totalorder %s1191_s21, %s1503_s14 }
  0x50   : > { %p1195_p1 = pneg %p1194_p0  ;;  %p1199_p6 = por %p1198_p13, %p1197_p4 }
  0x52   : > { %p1201_p3 = por %p1200_p10, %p1199_p6 }
  0x54   : > { %p1202_p5 = pnand %p1201_p3, %p1195_p1 }
  0x56   : > { %1205 = shalt.err (!%p1202_p5)
}
  0x57   : > { %s1206_s23 = scalar_lea.vmem %s1511_s15, 256  ;;  %s1313_s10 = smov [#allocation4]  }
  0x58   : > { %p1207_p9 = scmp.ne.s32.totalorder %s1511_s15, %s1206_s23  ;;  %s1211_s22 = sshll.u32 %s1313_s10, 4  ;;  %s1212_s22 = int_to_ptr.vmem [resolvable:$false] %s1211_s22 }
  0x59   : > { %s1213_s18 = scalar_lea.vmem %s1212_s22, 512  ;;  %p1214_p7 = scmp.lt.s32.totalorder %s1511_s15, %s1212_s22 }
  0x5a   : > { %p1209_p11 = pnand %p1207_p9, %p1193_p12  ;;  %p1215_p4 = scmp.lt.s32.totalorder %s1213_s18, %s1206_s23 }
  0x5c   : > { %p1210_p0 = pneg %p1209_p11  ;;  %p1216_p13 = por %p1215_p4, %p1214_p7 }
  0x5e   : > { %p1217_p6 = pnand %p1216_p13, %p1210_p0 }
  0x60   : > { %1220 = shalt.err (!%p1217_p6)
}
  0x61   : > { %1067 = dma.hbm_to_vmem [thread:$0]  (!%p1507_p2), %s1503_s14, 256, %s1511_s15, %s298_s12  }
  0x62   : > { %318 = sbr.rel (%p1410_p8) target bundleno = 897 (0x381), region = 48  ;;  %s1541_s21 = sand.u32 (!%p1410_p8), 1, %s1291_s25  }
  0x63   : > { %s905_s17 = sshll.u32 (!%p1410_p8), %s1541_s21, 4  ;;  %s321_s30 = scalar_lea.sflag (!%p1410_p8), [#allocation5], %s1541_s21 }
  0x64   : > { %s324_s8 = scalar_lea.vmem (!%p1410_p8), [#allocation4], %s905_s17  ;;  %p1672_p7 = scmp.ne.s32.totalorder (!%p1410_p8), %s1665_s11, 0 }
  0x69   : > { %1274 = dma.done.wait (%p1672_p7), %s321_s30, 256  }
  0x6a   : > { %1276 = vsyncadd (%p1672_p7), %s321_s30, 4294967040  ;;  %p1673_p2 = scmp.ne.s32.totalorder %s1663_s9, 0 }
  0x6c   : > { %1278 = dma.done.wait (%p1673_p2), [#allocation8], 16384  }
  0x6d   : > { %1280 = vsyncadd (%p1673_p2), [#allocation8], 4294950912  ;;  %v380_v0 = vlaneseq  ;;  %v1314_v2 = vmov 0.0   ;;  %v1558_v4 = vld [vmem:[%s324_s8] sm:$0xff]  ;;  %v1560_v5 = vld [vmem:[%s324_s8 + $0x8] sm:$0xff]  ;;  %s916_s10 = sshll.u32 %s1299_s27, 8 }
  0x6e   : > { %v390_v7 = vmul.f32 0.0, %v1560_v5  ;;  %v452_v9 = vld [vmem:[#allocation7 + $0x8] sm:$0xff]  ;;  %v454_v10 = vld [vmem:[#allocation7 + $0x18] sm:$0xff]  ;;  %v451_v11 = vld [vmem:[#allocation7] sm:$0xff]  ;;  %s366_s22 = scalar_lea.vmem [#allocation10], %s905_s17  ;;  %s1599_s9 = scalar_lea.hbm %s1655_s7, %s916_s10 }
  0x6f   : > { %v381_v1 = vand.u32 127, %v380_v0  ;;  %v917_v12 = vpack.c.bf16 %v454_v10, %v452_v9  ;;  %v453_v13 = vld [vmem:[#allocation7 + $0x10] sm:$0xff]  ;;  %v456_v14 = vld [vmem:[#allocation7 + $0x28] sm:$0xff]  ;;  %v458_v15 = vld [vmem:[#allocation7 + $0x38] sm:$0xff]  ;;  %s781_s18 = sshll.u32 %s366_s22, 4  ;;  %s767_s27 = scalar_lea.sflag [#allocation6], %s1541_s21  ;;  %s1601_s18 = int_to_ptr.vmem [resolvable:$true] %s781_s18 }
  0x70   : > { %v919_v16 = vpack.c.bf16 %v453_v13, %v451_v11  ;;  %v921_v17 = vpack.c.bf16 %v458_v15, %v456_v14  ;;  %v455_v18 = vld [vmem:[#allocation7 + $0x20] sm:$0xff]  ;;  %v457_v19 = vld [vmem:[#allocation7 + $0x30] sm:$0xff]  ;;  %v460_v20 = vld [vmem:[#allocation7 + $0x48] sm:$0xff]  ;;  %s1221_s11 = scalar_lea.vmem %s1601_s18, 256  ;;  %p1674_p12 = scmp.ne.s32.totalorder %s1670_s16, 0 }
  0x71   : > { %vm383_vm0 = vcmp.lt.s32.totalorder %v381_v1, 32  ;;  %918 = vmatprep.subr.bf16.mxu0 %v917_v12  ;;  %v462_v21 = vld [vmem:[#allocation7 + $0x58] sm:$0xff]  ;;  %v923_v22 = vpack.c.bf16 %v457_v19, %v455_v18  ;;  %v459_v24 = vld [vmem:[#allocation7 + $0x40] sm:$0xff]  ;;  %v461_v25 = vld [vmem:[#allocation7 + $0x50] sm:$0xff]  ;;  %p1222_p8 = scmp.ne.s32.totalorder %s1601_s18, %s1221_s11  ;;  %s1315_s17 = smov [#allocation10]  }
  0x72   : > { %v1556_v3 = vsel %vm383_vm0, 1.0, %v1314_v2  ;;  %920 = vmatpush1.bf16.msra.mxu0 %v919_v16  ;;  %v925_v23 = vpack.c.bf16 %v462_v21, %v460_v20  ;;  %v464_v26 = vld [vmem:[#allocation7 + $0x68] sm:$0xff]  ;;  %v466_v27 = vld [vmem:[#allocation7 + $0x78] sm:$0xff]  ;;  %v927_v28 = vpack.c.bf16 %v461_v25, %v459_v24  ;;  %v463_v30 = vld [vmem:[#allocation7 + $0x60] sm:$0xff]  ;;  %s1225_s13 = sshll.u32 %s1315_s17, 4  ;;  %s1226_s13 = int_to_ptr.vmem [resolvable:$false] %s1225_s13 }
  0x73   : > { %v389_v6 = vmul.f32 %v1556_v3, %v1558_v4  ;;  %922 = vmatprep.subr.bf16.mxu0 %v921_v17  ;;  %v929_v29 = vpack.c.bf16 %v466_v27, %v464_v26  ;;  %v465_v31 = vld [vmem:[#allocation7 + $0x70] sm:$0xff]  ;;  %v468_v32 = vld [vmem:[#allocation7 + $0x88] sm:$0xff]  ;;  %v470_v33 = vld [vmem:[#allocation7 + $0x98] sm:$0xff]  ;;  %p1223_p1 = pnand %p1222_p8, %p1674_p12  ;;  %s1227_s14 = scalar_lea.vmem %s1226_s13, 512 }
  0x74   : > { %v931_v34 = vpack.c.bf16 %v465_v31, %v463_v30  ;;  %v933_v35 = vpack.c.bf16 %v470_v33, %v468_v32  ;;  %v467_v36 = vld [vmem:[#allocation7 + $0x80] sm:$0xff]  ;;  %v469_v37 = vld [vmem:[#allocation7 + $0x90] sm:$0xff]  ;;  %v472_v38 = vld [vmem:[#allocation7 + $0xa8] sm:$0xff]  ;;  %p1228_p3 = scmp.lt.s32.totalorder %s1601_s18, %s1226_s13  ;;  %p1229_p5 = scmp.lt.s32.totalorder %s1227_s14, %s1221_s11 }
  0x75   : > { %v391_v8 = vadd.f32 %v390_v7, %v389_v6  ;;  %v474_v39 = vld [vmem:[#allocation7 + $0xb8] sm:$0xff]  ;;  %v935_v40 = vpack.c.bf16 %v469_v37, %v467_v36  ;;  %v471_v42 = vld [vmem:[#allocation7 + $0xa0] sm:$0xff]  ;;  %v473_v43 = vld [vmem:[#allocation7 + $0xb0] sm:$0xff]  ;;  %p1224_p10 = pneg %p1223_p1 }
  0x76   : > { %924 = vmatpush1.bf16.msra.mxu0 %v923_v22  ;;  %v937_v41 = vpack.c.bf16 %v474_v39, %v472_v38  ;;  %v476_v44 = vld [vmem:[#allocation7 + $0xc8] sm:$0xff]  ;;  %v478_v45 = vld [vmem:[#allocation7 + $0xd8] sm:$0xff]  ;;  %v939_v46 = vpack.c.bf16 %v473_v43, %v471_v42  ;;  %v475_v48 = vld [vmem:[#allocation7 + $0xc0] sm:$0xff]  ;;  %p1230_p9 = por %p1229_p5, %p1228_p3 }
  0x77   : > { %392 = vadd.xlane.f32.xlu0 %v391_v8  ;;  %926 = vmatprep.subr.bf16.mxu0 %v925_v23  ;;  %v941_v47 = vpack.c.bf16 %v478_v45, %v476_v44  ;;  %v477_v49 = vld [vmem:[#allocation7 + $0xd0] sm:$0xff]  ;;  %v480_v50 = vld [vmem:[#allocation7 + $0xe8] sm:$0xff]  ;;  %v482_v51 = vld [vmem:[#allocation7 + $0xf8] sm:$0xff] }
  0x78   : > { %v943_v52 = vpack.c.bf16 %v477_v49, %v475_v48  ;;  %v945_v53 = vpack.c.bf16 %v482_v51, %v480_v50  ;;  %v479_v63 = vld [vmem:[#allocation7 + $0xe0] sm:$0xff]  ;;  %v481_v1 = vld [vmem:[#allocation7 + $0xf0] sm:$0xff]  ;;  %v484_v6 = vld [vmem:[#allocation7 + $0x108] sm:$0xff]  ;;  %p1231_p11 = pnand %p1230_p9, %p1224_p10 }
  0x79   : > { %v947_v2 = vpack.c.bf16 %v481_v1, %v479_v63  ;;  %v486_v7 = vld [vmem:[#allocation7 + $0x118] sm:$0xff]  ;;  %v483_v9 = vld [vmem:[#allocation7 + $0x100] sm:$0xff]  ;;  %v488_v11 = vld [vmem:[#allocation7 + $0x128] sm:$0xff] }
  0x7a   : > { %928 = vmatpush1.bf16.msra.mxu0 %v927_v28  ;;  %v949_v8 = vpack.c.bf16 %v486_v7, %v484_v6  ;;  %v490_v12 = vld [vmem:[#allocation7 + $0x138] sm:$0xff]  ;;  %v487_v14 = vld [vmem:[#allocation7 + $0x120] sm:$0xff]  ;;  %v489_v15 = vld [vmem:[#allocation7 + $0x130] sm:$0xff] }
  0x7b   : > { %930 = vmatprep.subr.bf16.mxu0 %v929_v29  ;;  %v953_v13 = vpack.c.bf16 %v490_v12, %v488_v11  ;;  %v955_v16 = vpack.c.bf16 %v489_v15, %v487_v14  ;;  %v492_v17 = vld [vmem:[#allocation7 + $0x148] sm:$0xff]  ;;  %v494_v18 = vld [vmem:[#allocation7 + $0x158] sm:$0xff]  ;;  %v491_v20 = vld [vmem:[#allocation7 + $0x140] sm:$0xff] }
  0x7c   : > { %v957_v19 = vpack.c.bf16 %v494_v18, %v492_v17  ;;  %v493_v21 = vld [vmem:[#allocation7 + $0x150] sm:$0xff]  ;;  %v496_v23 = vld [vmem:[#allocation7 + $0x168] sm:$0xff]  ;;  %v498_v24 = vld [vmem:[#allocation7 + $0x178] sm:$0xff] }
  0x7d   : > { %v959_v22 = vpack.c.bf16 %v493_v21, %v491_v20  ;;  %v961_v25 = vpack.c.bf16 %v498_v24, %v496_v23  ;;  %v495_v26 = vld [vmem:[#allocation7 + $0x160] sm:$0xff]  ;;  %v497_v27 = vld [vmem:[#allocation7 + $0x170] sm:$0xff]  ;;  %v500_v28 = vld [vmem:[#allocation7 + $0x188] sm:$0xff] }
  0x7e   : > { %932 = vmatpush1.bf16.msra.mxu0 %v931_v34  ;;  %v963_v29 = vpack.c.bf16 %v497_v27, %v495_v26  ;;  %v502_v30 = vld [vmem:[#allocation7 + $0x198] sm:$0xff]  ;;  %v499_v31 = vld [vmem:[#allocation7 + $0x180] sm:$0xff]  ;;  %v501_v32 = vld [vmem:[#allocation7 + $0x190] sm:$0xff] }
  0x7f   : > { %934 = vmatprep.subr.bf16.mxu0 %v933_v35  ;;  %v965_v33 = vpack.c.bf16 %v502_v30, %v500_v28  ;;  %v504_v34 = vld [vmem:[#allocation7 + $0x1a8] sm:$0xff]  ;;  %v506_v35 = vld [vmem:[#allocation7 + $0x1b8] sm:$0xff]  ;;  %v967_v36 = vpack.c.bf16 %v501_v32, %v499_v31  ;;  %v503_v38 = vld [vmem:[#allocation7 + $0x1a0] sm:$0xff] }
  0x80   : > { %v969_v37 = vpack.c.bf16 %v506_v35, %v504_v34  ;;  %v505_v39 = vld [vmem:[#allocation7 + $0x1b0] sm:$0xff]  ;;  %v507_v44 = vld [vmem:[#allocation7 + $0x1c0] sm:$0xff]  ;;  %v611_v6 = vld [vmem:[#allocation9 + $0x48] sm:$0xff] }
  0x81   : > { %v971_v42 = vpack.c.bf16 %v505_v39, %v503_v38  ;;  %v509_v45 = vld [vmem:[#allocation7 + $0x1d0] sm:$0xff]  ;;  %v511_v50 = vld [vmem:[#allocation7 + $0x1e0] sm:$0xff]  ;;  %v613_v7 = vld [vmem:[#allocation9 + $0x58] sm:$0xff] }
  0x82   : > { %936 = vmatpush1.bf16.msra.mxu0 %v935_v40  ;;  %v508_v40 = vld [vmem:[#allocation7 + $0x1c8] sm:$0xff]  ;;  %v975_v48 = vpack.c.bf16 %v509_v45, %v507_v44  ;;  %v513_v51 = vld [vmem:[#allocation7 + $0x1f0] sm:$0xff]  ;;  %v606_v1 = vld [vmem:[#allocation9 + $0x20] sm:$0xff] }
  0x83   : > { %938 = vmatprep.subr.bf16.mxu0 %v937_v41  ;;  %v510_v41 = vld [vmem:[#allocation7 + $0x1d8] sm:$0xff]  ;;  %v615_v11 = vld [vmem:[#allocation9 + $0x68] sm:$0xff]  ;;  %v614_v15 = vld [vmem:[#allocation9 + $0x60] sm:$0xff] }
  0x84   : > { %v973_v43 = vpack.c.bf16 %v510_v41, %v508_v40  ;;  %v617_v12 = vld [vmem:[#allocation9 + $0x78] sm:$0xff]  ;;  %v619_v17 = vld [vmem:[#allocation9 + $0x88] sm:$0xff]  ;;  %v618_v21 = vld [vmem:[#allocation9 + $0x80] sm:$0xff] }
  0x85   : > { %v993_v14 = vpack.c.bf16 %v617_v12, %v615_v11  ;;  %v621_v18 = vld [vmem:[#allocation9 + $0x98] sm:$0xff]  ;;  %v623_v23 = vld [vmem:[#allocation9 + $0xa8] sm:$0xff]  ;;  %v622_v27 = vld [vmem:[#allocation9 + $0xa0] sm:$0xff] }
  0x86   : > { %940 = vmatpush1.bf16.msra.mxu0 %v939_v46  ;;  %v512_v46 = vld [vmem:[#allocation7 + $0x1e8] sm:$0xff]  ;;  %v997_v20 = vpack.c.bf16 %v621_v18, %v619_v17  ;;  %v625_v24 = vld [vmem:[#allocation9 + $0xb8] sm:$0xff]  ;;  %v624_v28 = vld [vmem:[#allocation9 + $0xb0] sm:$0xff] }
  0x87   : > { %942 = vmatprep.subr.bf16.mxu0 %v941_v47  ;;  %v514_v47 = vld [vmem:[#allocation7 + $0x1f8] sm:$0xff]  ;;  %v1001_v26 = vpack.c.bf16 %v625_v24, %v623_v23  ;;  %v1003_v31 = vpack.c.bf16 %v624_v28, %v622_v27  ;;  %v628_v34 = vld [vmem:[#allocation9 + $0xd0] sm:$0xff]  ;;  %v631_v35 = vld [vmem:[#allocation9 + $0xe8] sm:$0xff]  ;;  %v418_v28 = vshrl.u32 %v380_v0, 7 }
  0x88   : > { %v977_v49 = vpack.c.bf16 %v514_v47, %v512_v46  ;;  %v629_v30 = vld [vmem:[#allocation9 + $0xd8] sm:$0xff]  ;;  %v630_v39 = vld [vmem:[#allocation9 + $0xe0] sm:$0xff]  ;;  %v632_v40 = vld [vmem:[#allocation9 + $0xf0] sm:$0xff] }
  0x89   : > { %v635_v41 = vld [vmem:[#allocation9 + $0x108] sm:$0xff]  ;;  %v634_v45 = vld [vmem:[#allocation9 + $0x100] sm:$0xff]  ;;  %v636_v46 = vld [vmem:[#allocation9 + $0x110] sm:$0xff] }
  0x8a   : > { %944 = vmatpush1.bf16.msra.mxu0 %v943_v52  ;;  %v979_v52 = vpack.c.bf16 %v513_v51, %v511_v50  ;;  %v639_v47 = vld [vmem:[#allocation9 + $0x128] sm:$0xff]  ;;  %v638_v51 = vld [vmem:[#allocation9 + $0x120] sm:$0xff]  ;;  %v652_v11 = vld [vmem:[#allocation9 + $0x190] sm:$0xff] }
  0x8b   : > { %946 = vmatprep.subr.bf16.mxu0 %v945_v53  ;;  %v603_v53 = vld [vmem:[#allocation9 + $0x8] sm:$0xff]  ;;  %v656_v17 = vld [vmem:[#allocation9 + $0x1b0] sm:$0xff] }
  0x8c   : > { %v655_v12 = vld [vmem:[#allocation9 + $0x1a8] sm:$0xff] }
  0x8d   : > { %v659_v18 = vld [vmem:[#allocation9 + $0x1c8] sm:$0xff] }
  0x8e   : > { %948 = vmatpush1.bf16.msra.mxu0 %v947_v2  ;;  %v608_v2 = vld [vmem:[#allocation9 + $0x30] sm:$0xff] }
  0x8f   : > { %950 = vmatprep.subr.bf16.mxu0 %v949_v8  ;;  %v987_v8 = vpack.c.bf16 %v608_v2, %v606_v1  ;;  %v646_v2 = vld [vmem:[#allocation9 + $0x160] sm:$0xff] }
 0x104   : > { %v393_v54 = vpop.xlane.xlu0 %392 }
 0x105   : > { %v394_v55 = vmul.f32 0.03125, %v393_v54  ;;  %v605_v54 = vld [vmem:[#allocation9 + $0x18] sm:$0xff] }
 0x107   : > { %v395_v56 = vsub.f32 %v1558_v4, %v394_v55  ;;  %v396_v57 = vsub.f32 %v1560_v5, %v394_v55  ;;  %v602_v55 = vld [vmem:[#allocation9] sm:$0xff] }
 0x109   : > { %v1568_v58 = vmul.f32 %v1556_v3, %v395_v56  ;;  %v1570_v59 = vmul.f32 0.0, %v396_v57  ;;  %v485_v3 = vld [vmem:[#allocation7 + $0x110] sm:$0xff]  ;;  %v981_v56 = vpack.c.bf16 %v605_v54, %v603_v53  ;;  %v643_v53 = vld [vmem:[#allocation9 + $0x148] sm:$0xff]  ;;  %v645_v54 = vld [vmem:[#allocation9 + $0x158] sm:$0xff] }
 0x10a   : > { %v951_v10 = vpack.c.bf16 %v485_v3, %v483_v9  ;;  %v604_v57 = vld [vmem:[#allocation9 + $0x10] sm:$0xff]  ;;  %v989_v9 = vpack.c.bf16 %v613_v7, %v611_v6  ;;  %v610_v3 = vld [vmem:[#allocation9 + $0x40] sm:$0xff]  ;;  %v651_v7 = vld [vmem:[#allocation9 + $0x188] sm:$0xff] }
 0x10b   : > { %v399_v60 = vmul.f32 %v1568_v58, %v1568_v58  ;;  %v400_v61 = vmul.f32 %v1570_v59, %v1570_v59  ;;  %982 = vmatprep.subr.bf16.mxu1 %v981_v56  ;;  %v1021_v56 = vpack.c.bf16 %v645_v54, %v643_v53  ;;  %v648_v6 = vld [vmem:[#allocation9 + $0x170] sm:$0xff] }
 0x10c   : > { %952 = vmatpush1.bf16.msra.mxu0 %v951_v10  ;;  %v612_v10 = vld [vmem:[#allocation9 + $0x50] sm:$0xff] }
 0x10d   : > { %v401_v62 = vadd.f32 %v400_v61, %v399_v60  ;;  %954 = vmatprep.subr.bf16.mxu0 %v953_v13  ;;  %v607_v60 = vld [vmem:[#allocation9 + $0x28] sm:$0xff]  ;;  %v609_v61 = vld [vmem:[#allocation9 + $0x38] sm:$0xff]  ;;  %v991_v13 = vpack.c.bf16 %v612_v10, %v610_v3  ;;  %v650_v10 = vld [vmem:[#allocation9 + $0x180] sm:$0xff] }
 0x10e   : > { %v985_v63 = vpack.c.bf16 %v609_v61, %v607_v60  ;;  %v644_v60 = vld [vmem:[#allocation9 + $0x150] sm:$0xff]  ;;  %v647_v61 = vld [vmem:[#allocation9 + $0x168] sm:$0xff] }
 0x10f   : > { %402 = vadd.xlane.f32.xlu0 %v401_v62  ;;  %v983_v62 = vpack.c.bf16 %v604_v57, %v602_v55  ;;  %v642_v57 = vld [vmem:[#allocation9 + $0x140] sm:$0xff] }
 0x110   : > { %956 = vmatpush1.bf16.msra.mxu0 %v955_v16  ;;  %v616_v16 = vld [vmem:[#allocation9 + $0x70] sm:$0xff] }
 0x111   : > { %958 = vmatprep.subr.bf16.mxu0 %v957_v19  ;;  %984 = vmatpush1.bf16.msra.mxu1 %v983_v62  ;;  %v995_v19 = vpack.c.bf16 %v616_v16, %v614_v15  ;;  %v649_v62 = vld [vmem:[#allocation9 + $0x178] sm:$0xff]  ;;  %v654_v16 = vld [vmem:[#allocation9 + $0x1a0] sm:$0xff] }
 0x112   : > { %986 = vmatprep.subr.bf16.mxu1 %v985_v63  ;;  %v1023_v63 = vpack.c.bf16 %v644_v60, %v642_v57  ;;  %v1025_v1 = vpack.c.bf16 %v649_v62, %v647_v61 }
 0x114   : > { %960 = vmatpush1.bf16.msra.mxu0 %v959_v22  ;;  %v620_v22 = vld [vmem:[#allocation9 + $0x90] sm:$0xff] }
 0x115   : > { %962 = vmatprep.subr.bf16.mxu0 %v961_v25  ;;  %988 = vmatpush1.bf16.msra.mxu1 %v987_v8  ;;  %v999_v25 = vpack.c.bf16 %v620_v22, %v618_v21  ;;  %v653_v8 = vld [vmem:[#allocation9 + $0x198] sm:$0xff] }
 0x116   : > { %990 = vmatprep.subr.bf16.mxu1 %v989_v9  ;;  %v1027_v9 = vpack.c.bf16 %v648_v6, %v646_v2  ;;  %v1029_v3 = vpack.c.bf16 %v653_v8, %v651_v7 }
 0x118   : > { %964 = vmatpush1.bf16.msra.mxu0 %v963_v29  ;;  %v627_v29 = vld [vmem:[#allocation9 + $0xc8] sm:$0xff] }
 0x119   : > { %966 = vmatprep.subr.bf16.mxu0 %v965_v33  ;;  %992 = vmatpush1.bf16.msra.mxu1 %v991_v13  ;;  %v1005_v32 = vpack.c.bf16 %v629_v30, %v627_v29  ;;  %v626_v33 = vld [vmem:[#allocation9 + $0xc0] sm:$0xff]  ;;  %v657_v13 = vld [vmem:[#allocation9 + $0x1b8] sm:$0xff] }
 0x11a   : > { %994 = vmatprep.subr.bf16.mxu1 %v993_v14  ;;  %v1031_v14 = vpack.c.bf16 %v652_v11, %v650_v10  ;;  %v1033_v15 = vpack.c.bf16 %v657_v13, %v655_v12 }
 0x11c   : > { %968 = vmatpush1.bf16.msra.mxu0 %v967_v36  ;;  %v633_v36 = vld [vmem:[#allocation9 + $0xf8] sm:$0xff] }
 0x11d   : > { %970 = vmatprep.subr.bf16.mxu0 %v969_v37  ;;  %996 = vmatpush1.bf16.msra.mxu1 %v995_v19  ;;  %v1007_v37 = vpack.c.bf16 %v628_v34, %v626_v33  ;;  %v1009_v38 = vpack.c.bf16 %v633_v36, %v631_v35  ;;  %v661_v19 = vld [vmem:[#allocation9 + $0x1d8] sm:$0xff]  ;;  %v415_v33 = vld [vmem:[%s1649_s1] sm:$0x3] }
 0x11e   : > { %998 = vmatprep.subr.bf16.mxu1 %v997_v20  ;;  %v1035_v20 = vpack.c.bf16 %v656_v17, %v654_v16  ;;  %v1037_v21 = vpack.c.bf16 %v661_v19, %v659_v18  ;;  %v431_v36 = vld [vmem:[%s1650_s2] sm:$0x3] }
 0x120   : > { %972 = vmatpush1.bf16.msra.mxu0 %v971_v42  ;;  %v637_v42 = vld [vmem:[#allocation9 + $0x118] sm:$0xff] }
 0x121   : > { %974 = vmatprep.subr.bf16.mxu0 %v973_v43  ;;  %1000 = vmatpush1.bf16.msra.mxu1 %v999_v25  ;;  %v1011_v43 = vpack.c.bf16 %v632_v40, %v630_v39  ;;  %v1013_v44 = vpack.c.bf16 %v637_v42, %v635_v41 }
 0x122   : > { %1002 = vmatprep.subr.bf16.mxu1 %v1001_v26 }
 0x124   : > { %976 = vmatpush1.bf16.msra.mxu0 %v975_v48  ;;  %v641_v48 = vld [vmem:[#allocation9 + $0x138] sm:$0xff] }
 0x125   : > { %978 = vmatprep.subr.bf16.mxu0 %v977_v49  ;;  %1004 = vmatpush1.bf16.msra.mxu1 %v1003_v31  ;;  %v1015_v49 = vpack.c.bf16 %v636_v46, %v634_v45  ;;  %v1017_v50 = vpack.c.bf16 %v641_v48, %v639_v47  ;;  %v419_v31 = vsub.s32 0, %v418_v28  ;;  %v658_v45 = vld [vmem:[#allocation9 + $0x1c0] sm:$0xff]  ;;  %v660_v46 = vld [vmem:[#allocation9 + $0x1d0] sm:$0xff]  ;;  %v663_v48 = vld [vmem:[#allocation9 + $0x1e8] sm:$0xff] }
 0x126   : > { %1006 = vmatprep.subr.bf16.mxu1 %v1005_v32  ;;  %v423_v32 = vsub.s32 1, %v418_v28  ;;  %v1039_v47 = vpack.c.bf16 %v660_v46, %v658_v45 }
 0x127   : > { %v420_v34 = vrot.slane %v415_v33, %v419_v31  ;;  %v436_v0 = vrot.slane %v431_v36, %v419_v31 }
 0x128   : > { %980 = vmatpush1.bf16.msra.mxu0 %v979_v52  ;;  %v640_v52 = vld [vmem:[#allocation9 + $0x130] sm:$0xff]  ;;  %v424_v35 = vrot.slane %v415_v33, %v423_v32  ;;  %v440_v39 = vrot.slane %v431_v36, %v423_v32 }
 0x129   : > { %1008 = vmatpush1.bf16.msra.mxu1 %v1007_v37  ;;  %v1019_v55 = vpack.c.bf16 %v640_v52, %v638_v51  ;;  %v427_v37 = vmul.f32 %v420_v34, %v1568_v58  ;;  %v662_v51 = vld [vmem:[#allocation9 + $0x1e0] sm:$0xff]  ;;  %v664_v58 = vld [vmem:[#allocation9 + $0x1f0] sm:$0xff] }
 0x12a   : > { %1010 = vmatprep.subr.bf16.mxu1 %v1009_v38  ;;  %v428_v38 = vmul.f32 %v424_v35, %v1570_v59  ;;  %v1043_v52 = vpack.c.bf16 %v664_v58, %v662_v51  ;;  %v515_v59 = vld [vmem:[%s1652_s4] sm:$0x3] }
 0x12b   : > { %v520_v53 = vrot.slane %v515_v59, %v419_v31  ;;  %v524_v54 = vrot.slane %v515_v59, %v423_v32 }
 0x12d   : > { %1012 = vmatpush1.bf16.msra.mxu1 %v1011_v43 }
 0x12e   : > { %1014 = vmatprep.subr.bf16.mxu1 %v1013_v44 }
 0x131   : > { %1016 = vmatpush1.bf16.msra.mxu1 %v1015_v49  ;;  %v665_v49 = vld [vmem:[#allocation9 + $0x1f8] sm:$0xff] }
 0x132   : > { %1018 = vmatprep.subr.bf16.mxu1 %v1017_v50  ;;  %v1041_v50 = vpack.c.bf16 %v665_v49, %v663_v48 }
 0x135   : > { %1020 = vmatpush1.bf16.msra.mxu1 %v1019_v55 }
 0x136   : > { %1022 = vmatprep.subr.bf16.mxu1 %v1021_v56 }
 0x139   : > { %1024 = vmatpush1.bf16.msra.mxu1 %v1023_v63  ;;  %v750_v63 = vld [vmem:[%s1654_s6] sm:$0x3] }
 0x13a   : > { %1026 = vmatprep.subr.bf16.mxu1 %v1025_v1  ;;  %v755_v1 = vrot.slane %v750_v63, %v419_v31  ;;  %v759_v6 = vrot.slane %v750_v63, %v423_v32 }
 0x13d   : > { %1028 = vmatpush1.bf16.msra.mxu1 %v1027_v9 }
 0x13e   : > { %1030 = vmatprep.subr.bf16.mxu1 %v1029_v3 }
 0x141   : > { %1032 = vmatpush1.bf16.msra.mxu1 %v1031_v14 }
 0x142   : > { %1034 = vmatprep.subr.bf16.mxu1 %v1033_v15 }
 0x145   : > { %1036 = vmatpush1.bf16.msra.mxu1 %v1035_v20 }
 0x146   : > { %1038 = vmatprep.subr.bf16.mxu1 %v1037_v21 }
 0x149   : > { %1040 = vmatpush1.bf16.msra.mxu1 %v1039_v47 }
 0x14a   : > { %1042 = vmatprep.subr.bf16.mxu1 %v1041_v50 }
 0x14d   : > { %1044 = vmatpush1.bf16.msra.mxu1 %v1043_v52 }
 0x19c   : > { %v403_v22 = vpop.xlane.xlu0 %402 }
 0x19d   : > { %v404_v23 = vmul.f32 0.032258064, %v403_v22 }
 0x19f   : > { %1131 = vrsqrt.f32 %v404_v23  ;;  %vm407_vm1 = vcmp.eq.f32.partialorder %v404_v23, inf  ;;  %v410_v26 = vand.u32 2147483648, %v404_v23  ;;  %vm409_vm2 = vcmp.eq.f32.partialorder %v404_v23, 0.0 }
 0x1a9   : > { %v1132_v24 = vpop.eup %1131 }
 0x1aa   : > { %v406_v25 = vmul.f32 %v1132_v24, %v404_v23 }
 0x1ac   : > { %v408_v27 = vsel %vm407_vm1, %v404_v23, %v406_v25 }
 0x1ad   : > { %v411_v29 = vsel %vm409_vm2, %v410_v26, %v408_v27 }
 0x1ae   : > { %v412_v30 = vadd.f32 1e-06, %v411_v29 }
 0x1b0   : > { %1133 = vrcp.f32 %v412_v30 }
 0x1ba   : > { %v1134_v40 = vpop.eup %1133 }
 0x1bb   : > { %v430_v41 = vmul.f32 %v1134_v40, %v428_v38  ;;  %v429_v42 = vmul.f32 %v1134_v40, %v427_v37 }
 0x1bd   : > { %v444_v43 = vadd.f32 %v440_v39, %v430_v41  ;;  %v443_v44 = vadd.f32 %v436_v0, %v429_v42 }
 0x1bf   : > { %591 = vmatprep.mubr.f32.mxu0 %v444_v43 }
 0x1c0   : > { %592 = vmatmul.mubr.f32.vlgmr.msra.gmra.mrb[0].mxu0 %v443_v44 }
 0x293   : > { %v593_v55 = vpop.f32.mrb[0].mxu0 }
 0x294   : > { %v594_v56 = vadd.f32 %v593_v55, %v520_v53  ;;  %v595_v57 = vpop.f32.mrb[1].mxu0 }
 0x295   : > { %v596_v60 = vadd.f32 %v595_v57, %v524_v54 }
 0x296   : > { %v598_v62 = vmax.f32 %v594_v56, 0.0 }
 0x297   : > { %v599_v61 = vmax.f32 %v596_v60, 0.0 }
 0x299   : > { %730 = vmatprep.mubr.f32.mxu1 %v599_v61 }
 0x29a   : > { %731 = vmatmul.mubr.f32.vlgmr.msra.gmra.mrb[0].mxu1 %v598_v62 }
 0x36d   : > { %v732_v2 = vpop.f32.mrb[0].mxu1 }
 0x36e   : > { %v748_v7 = vadd.f32 %v732_v2, %v1558_v4  ;;  %v734_v8 = vpop.f32.mrb[1].mxu1 }
 0x36f   : > { %v749_v9 = vadd.f32 %v734_v8, %v1560_v5 }
 0x370   : > { %v762_v3 = vadd.f32 %v755_v1, %v748_v7 }
 0x371   : > { %v763_v10 = vadd.f32 %v759_v6, %v749_v9 }
 0x372   : > { %764 = vst [vmem:[%s366_s22] sm:$0xff] %v762_v3 }
 0x373   : > { %765 = vst [vmem:[%s366_s22 + $0x8] sm:$0xff] %v763_v10 }
 0x374   : > { %1234 = shalt.err (!%p1231_p11)
}
 0x375   : > { %s1235_s21 = scalar_lea.hbm %s1599_s9, 256  ;;  %s1239_s12 = scalar_lea.hbm %s1655_s7, 512 }
 0x376   : > { %p1236_p0 = scmp.ne.s32.totalorder %s1599_s9, %s1235_s21  ;;  %p1240_p6 = scmp.lt.u32.totalorder %s1599_s9, %s1655_s7 }
 0x377   : > { %p1241_p7 = scmp.lt.u32.totalorder %s1239_s12, %s1235_s21  ;;  %p1243_p8 = scmp.lt.u32.totalorder %s1235_s21, %s1599_s9 }
 0x378   : > { %p1237_p4 = pnand %p1236_p0, %p1674_p12 }
 0x379   : > { %p1242_p2 = por %p1241_p7, %p1240_p6 }
 0x37a   : > { %p1238_p13 = pneg %p1237_p4 }
 0x37b   : > { %p1244_p1 = por %p1243_p8, %p1242_p2 }
 0x37d   : > { %p1245_p10 = pnand %p1244_p1, %p1238_p13 }
 0x37f   : > { %1248 = shalt.err (!%p1245_p10)
}
 0x380   : > { %1055 = dma.vmem_to_hbm [thread:$0]  (%p1674_p12), %s1601_s18, 256, %s1599_s9, %s767_s27  }
 0x381 PF: > { %s1675_s22 = sld [smem:[#allocation14_spill]]  ;;  %s1676_s30 = sld [smem:[#allocation15_spill]] }
 0x382   : > { %p1678_p5 = scmp.ge.s32.totalorder %s1307_s29, 2 }
 0x387   : > { %s793_s8 = sand.u32 1, %s1675_s22   ;;  %p1677_p3 = scmp.ne.s32.totalorder %s1676_s30, 0 }
 0x388   : > { %s794_s11 = scalar_lea.sflag [#allocation6], %s793_s8 }
 0x389   : > { %p1069_p9 = pnand %p1678_p5, %p1677_p3 }
 0x38b   : > { %1282 = dma.done.wait (!%p1069_p9), %s794_s11, 256  }
 0x38c   : > { %1284 = vsyncadd (!%p1069_p9), %s794_s11, 4294967040  ;;  %s24_s29 = sadd.s32 1, %s1307_s29   ;;  %s1679_s24 = smov %s1291_s25 }
 0x38d   : > { %p21_p11 = scmp.ge.s32.totalorder %s24_s29, 4   ;;  %s1680_s25 = smov %s1295_s26 }
 0x38e   : > { %s1681_s26 = smov %s1498_s19  ;;  %s1682_s27 = smov %s1303_s28 }
 0x38f   : > { %s1683_s28 = smov %s1685_s20  ;;  %23 = sbr.rel (!%p21_p11) target bundleno = 7 (0x7), region = 114 }
 0x396   :  { %799 = vsyncpa [#allocation5], 1 }
 0x397   :  { %801 = vsyncpa [#allocation5 + $0x1], 1 }
 0x398   :  { %802 = vsyncpa [#allocation8], 1 }
 0x399   :  { %803 = vsyncpa [#allocation6], 1 }
 0x39a   :  { %805 = vsyncpa [#allocation6 + $0x1], 1 }

</bundles_post_ra>
